<compile_context>
chip_gen: v7x
topology: tpu7x:2x2x1
jax: 0.10.0
libtpu: 0.0.40
codegen_flags: <defaults>
</compile_context>

<pallas_src>
import functools

import jax
import jax.numpy as jnp
from jax import lax
from jax.experimental import pallas as pl
from jax.experimental.pallas import tpu as pltpu
import numpy as np


def _round_up(x, m):
    return ((x + m - 1) // m) * m


def _pick_sub_block(dim, cap):
    """Block size for a sublane (second-to-last) dim: full dim if it fits,
    else the largest multiple of 8 <= cap that divides dim, else cap
    (ragged tail handled by row padding)."""
    if dim <= cap:
        return dim
    for b in range(cap - cap % 8, 7, -8):
        if dim % b == 0:
            return b
    return cap - cap % 8


def _pick_lane_block(dim, cap):
    """Block size for a lane (last) dim: full dim if it fits, else the largest
    multiple of 128 <= cap dividing dim, else the full dim (always legal)."""
    if dim <= cap:
        return dim
    for b in range(cap - cap % 128, 127, -128):
        if dim % b == 0:
            return b
    return dim


# ----------------------------- tiled linear -----------------------------

def _linear_kernel(x_ref, w_ref, b_ref, o_ref, acc_ref):
    # x: (bm, bk), w: (bk, bn), b: (1, bn), o: (bm, bn); K axis = grid axis 2.
    @pl.when(pl.program_id(2) == 0)
    def _init():
        acc_ref[...] = jnp.zeros_like(acc_ref)

    acc_ref[...] += jnp.dot(x_ref[...], w_ref[...],
                            preferred_element_type=jnp.float32)

    @pl.when(pl.program_id(2) == pl.num_programs(2) - 1)
    def _finalize():
        o_ref[...] = (acc_ref[...] + b_ref[...].astype(jnp.float32)
                      ).astype(o_ref.dtype)


def pallas_linear(x, w, b, *, bm=512, bn=512, bk=1536):
    """x: (T, K) @ w: (K, N) + b: (N,) -> (T, N); f32 accumulation.

    Block sizes are chosen so that K and N never need padding (full-dim or a
    128-multiple divisor); only a ragged row (T) tail is ever padded.
    """
    T, K = x.shape
    Kw, N = w.shape
    assert Kw == K

    bm = _pick_sub_block(T, bm)
    bn = _pick_lane_block(N, bn)
    bk = _pick_lane_block(K, bk)

    Tp = _round_up(T, bm)
    xp = x if Tp == T else jnp.pad(x, ((0, Tp - T), (0, 0)))
    bp = b.reshape(1, N)

    out = pl.pallas_call(
        _linear_kernel,
        out_shape=jax.ShapeDtypeStruct((Tp, N), x.dtype),
        grid_spec=pltpu.PrefetchScalarGridSpec(
            num_scalar_prefetch=0,
            grid=(Tp // bm, N // bn, K // bk),
            in_specs=[
                pl.BlockSpec((bm, bk), lambda i, j, k: (i, k)),
                pl.BlockSpec((bk, bn), lambda i, j, k: (k, j)),
                pl.BlockSpec((1, bn), lambda i, j, k: (0, j)),
            ],
            out_specs=pl.BlockSpec((bm, bn), lambda i, j, k: (i, j)),
            scratch_shapes=[pltpu.VMEM((bm, bn), jnp.float32)],
        ),
        compiler_params=pltpu.CompilerParams(
            dimension_semantics=("parallel", "parallel", "arbitrary"),
            vmem_limit_bytes=48 * 1024 * 1024,
        ),
    )(xp, w, bp)

    return out if Tp == T else out[:T]


# ----------------------------- flash cross-attention -----------------------------

def _flash_xattn_kernel(*refs, needs_mask):
    # Grid: (H, Lq/bq, Lk/bkv); kv axis last ("arbitrary").
    # q_ref:  (1, bq, D)      one head's query tile (scale folded into weights)
    # kv_ref: (2, 1, bkv, D)  [k; v] tiles for the same head
    # bias:   (1, bkv)        -1e30 on zero-padded kv columns (only if padded)
    # o_ref:  (1, bq, D)
    # m/l:    (bq, 1) f32, acc: (bq, D) f32 -- online-softmax state in VMEM.
    if needs_mask:
        q_ref, kv_ref, bias_ref, o_ref, m_sc, l_sc, acc_sc = refs
    else:
        q_ref, kv_ref, o_ref, m_sc, l_sc, acc_sc = refs
        bias_ref = None

    kv_i = pl.program_id(2)

    @pl.when(kv_i == 0)
    def _init():
        m_sc[...] = jnp.full_like(m_sc, -jnp.inf)
        l_sc[...] = jnp.zeros_like(l_sc)
        acc_sc[...] = jnp.zeros_like(acc_sc)

    q = q_ref[0]        # (bq, D) bf16
    k = kv_ref[0, 0]    # (bkv, D)
    v = kv_ref[1, 0]    # (bkv, D)

    # Scores: contract last dims directly (no k^T materialized), f32 accumulate.
    s = lax.dot_general(q, k, (((1,), (1,)), ((), ())),
                        preferred_element_type=jnp.float32)      # (bq, bkv)

    if needs_mask:
        # Padding (< bkv rows) lives only in the last kv block; a single
        # precomputed additive bias row is cheaper than iota+compare+select
        # and zero for all fully-valid blocks.
        s = s + bias_ref[...]

    m_prev = m_sc[...]
    m_new = jnp.maximum(m_prev, jnp.max(s, axis=-1, keepdims=True))
    alpha = jnp.exp(m_prev - m_new)
    p = jnp.exp(s - m_new)
    l_sc[...] = alpha * l_sc[...] + jnp.sum(p, axis=-1, keepdims=True)
    m_sc[...] = m_new

    pv = lax.dot_general(p.astype(v.dtype), v, (((1,), (0,)), ((), ())),
                         preferred_element_type=jnp.float32)     # (bq, D)
    acc_sc[...] = alpha * acc_sc[...] + pv

    @pl.when(kv_i == pl.num_programs(2) - 1)
    def _finalize():
        # Exact reciprocal: runs once per (head, q-tile), essentially free.
        inv_l = pl.reciprocal(l_sc[...], approx=False)
        o_ref[0] = (acc_sc[...] * inv_l).astype(o_ref.dtype)


def pallas_cross_attention(q, kv, *, bq=512, bkv=1024):
    """q: (H, Lq, D), kv: (2, H, Lk, D) -> (H, Lq, D) = softmax(q k^T) v.

    The 1/sqrt(D) scale is assumed already folded into q.
    """
    H, Lq, D = q.shape
    two, Hk, Lk, Dk = kv.shape
    assert two == 2 and Hk == H and Dk == D

    bq = _pick_sub_block(Lq, bq)
    bkv = _pick_sub_block(Lk, bkv)
    Lq_p = _round_up(Lq, bq)
    Lk_p = _round_up(Lk, bkv)

    q_p = q if Lq_p == Lq else jnp.pad(q, ((0, 0), (0, Lq_p - Lq), (0, 0)))
    kv_p = kv if Lk_p == Lk else jnp.pad(
        kv, ((0, 0), (0, 0), (0, Lk_p - Lk), (0, 0)))

    needs_mask = Lk_p != Lk
    args = [q_p, kv_p]
    in_specs = [
        pl.BlockSpec((1, bq, D), lambda h, i, j: (h, i, 0)),
        pl.BlockSpec((2, 1, bkv, D), lambda h, i, j: (0, h, j, 0)),
    ]
    if needs_mask:
        # Padding is always < bkv, so every kv block keeps >=1 valid column
        # and the online max stays finite.
        bias = jnp.zeros((1, Lk_p), jnp.float32).at[:, Lk:].set(-1e30)
        args.append(bias)
        in_specs.append(pl.BlockSpec((1, bkv), lambda h, i, j: (0, j)))

    kernel = functools.partial(_flash_xattn_kernel, needs_mask=needs_mask)

    out = pl.pallas_call(
        kernel,
        out_shape=jax.ShapeDtypeStruct((H, Lq_p, D), q.dtype),
        grid_spec=pltpu.PrefetchScalarGridSpec(
            num_scalar_prefetch=0,
            grid=(H, Lq_p // bq, Lk_p // bkv),
            in_specs=in_specs,
            out_specs=pl.BlockSpec((1, bq, D), lambda h, i, j: (h, i, 0)),
            scratch_shapes=[
                pltpu.VMEM((bq, 1), jnp.float32),   # m
                pltpu.VMEM((bq, 1), jnp.float32),   # l
                pltpu.VMEM((bq, D), jnp.float32),   # acc
            ],
        ),
        compiler_params=pltpu.CompilerParams(
            dimension_semantics=("parallel", "parallel", "arbitrary"),
            vmem_limit_bytes=48 * 1024 * 1024,
        ),
    )(*args)

    return out if Lq_p == Lq else out[:, :Lq, :]


# ----------------------------- Module wrapper -----------------------------

class MultiHeadCrossAttentionPallas:
    def __init__(self, d_model, num_heads, key, *, param_dtype=jnp.bfloat16):
        assert d_model % num_heads == 0
        self.d_model = d_model
        self.num_heads = num_heads
        self.head_dim = d_model // num_heads
        ks = jax.random.split(key, 6)
        s = 1.0 / np.sqrt(d_model)
        # nn.Linear-style params, stored already transposed: (in, out). Kept in
        # f32 as the "true" parameters (reference uses these).
        self.wq = jax.random.uniform(ks[0], (d_model, d_model), jnp.float32, -s, s)
        self.bq = jax.random.uniform(ks[1], (d_model,), jnp.float32, -s, s)
        self.wkv = jax.random.uniform(ks[2], (d_model, 2 * d_model), jnp.float32, -s, s)
        self.bkv = jax.random.uniform(ks[3], (2 * d_model,), jnp.float32, -s, s)
        self.wproj = jax.random.uniform(ks[4], (d_model, d_model), jnp.float32, -s, s)
        self.bproj = jax.random.uniform(ks[5], (d_model,), jnp.float32, -s, s)

        # Kernel params prepared ONCE: attention scale 1/sqrt(D) folded into
        # the q projection (exact), everything cast to bf16 for MXU rate and
        # halved HBM traffic between the three pallas_calls.
        scale = 1.0 / float(np.sqrt(self.head_dim))
        self._dtype = param_dtype
        self._wq = (self.wq * scale).astype(param_dtype)
        self._bq = (self.bq * scale).astype(param_dtype)
        self._wkv = self.wkv.astype(param_dtype)
        self._bkv = self.bkv.astype(param_dtype)
        self._wproj = self.wproj.astype(param_dtype)
        self._bproj = self.bproj.astype(param_dtype)

    def __call__(self, x, cond, mask=None):
        # TODO(synk): mask != None (BlockDiagonalMask over seqlens) not implemented.
        # dropout p=0.0 -> no-op (eval semantics)
        B, N, C = x.shape
        Bc, M, _ = cond.shape
        H, D = self.num_heads, self.head_dim
        Lq, Lk = B * N, Bc * M

        xq = x.reshape(Lq, C).astype(self._dtype)
        xkv = cond.reshape(Lk, C).astype(self._dtype)

        # Projections (tiled Pallas matmuls), bf16 slabs.
        q = pallas_linear(xq, self._wq, self._bq)          # (Lq, C), scale folded
        kv = pallas_linear(xkv, self._wkv, self._bkv)      # (Lk, 2C)

        # Head-major layouts produced once per forward (plain XLA transposes),
        # so every per-head attention block is full-extent and lane-aligned.
        q_hmd = q.reshape(Lq, H, D).transpose(1, 0, 2)           # (H, Lq, D)
        kv_hmd = kv.reshape(Lk, 2, H, D).transpose(1, 2, 0, 3)   # (2, H, Lk, D)

        # Flash attention over batch-flattened sequences (xformers batch=1
        # quirk: every query attends to all batch items' cond tokens).
        o_hmd = pallas_cross_attention(q_hmd, kv_hmd)            # (H, Lq, D)
        o = o_hmd.transpose(1, 0, 2).reshape(Lq, C)

        out = pallas_linear(o, self._wproj, self._bproj)         # (Lq, C)
        return out.reshape(B, N, C).astype(x.dtype)


# ----------------------------- Reference (plain JAX, f32) -----------------------------

def reference_forward(mod, x, cond):
    B, N, C = x.shape
    Bc, M, _ = cond.shape
    H, D = mod.num_heads, mod.head_dim
    q = x.reshape(B * N, C) @ mod.wq + mod.bq
    kv = cond.reshape(Bc * M, C) @ mod.wkv + mod.bkv
    q = q.reshape(B * N, H, D)
    kv = kv.reshape(Bc * M, 2, H, D)
    k, v = kv[:, 0], kv[:, 1]
    s = jnp.einsum("qhd,khd->hqk", q, k) / np.sqrt(D)
    p = jax.nn.softmax(s, axis=-1)
    o = jnp.einsum("hqk,khd->qhd", p, v).reshape(B * N, C)
    return (o @ mod.wproj + mod.bproj).reshape(B, N, C)


if __name__ == "__main__":
    key = jax.random.PRNGKey(0)
    k_param, k_x, k_cond = jax.random.split(key, 3)

    d_model, num_heads = 32, 4
    B, N, M = 2, 8, 6  # batch, query tokens, cond tokens

    mod = MultiHeadCrossAttentionPallas(d_model, num_heads, k_param)
    x = jax.random.normal(k_x, (B, N, d_model), jnp.float32)
    cond = jax.random.normal(k_cond, (B, M, d_model), jnp.float32)

    out = jax.block_until_ready(mod(x, cond))
    assert out.shape == (B, N, d_model)

    # bf16 weights/intermediates (per perf feedback) -> relaxed tolerance vs
    # the f32 reference; softmax math and all accumulations remain f32.
    ref = reference_forward(mod, x, cond)
    np.testing.assert_allclose(np.asarray(out, np.float32), np.asarray(ref),
                               rtol=3e-2, atol=3e-2)

    print("KERNEL_OK")
</pallas_src>

<mosaic_0001>
module attributes {stable_mosaic.version = 11 : i64} {
  func.func @_linear_kernel(%arg0: i32, %arg1: i32, %arg2: i32, %arg3: memref<16x32xbf16, #tpu.memory_space<vmem>>, %arg4: memref<32x32xbf16, #tpu.memory_space<vmem>>, %arg5: memref<1x32xbf16, #tpu.memory_space<vmem>>, %arg6: memref<16x32xbf16, #tpu.memory_space<vmem>>, %arg7: memref<16x32xf32, #tpu.memory_space<vmem>>) attributes {dimension_semantics = [#tpu.dimension_semantics<parallel>, #tpu.dimension_semantics<parallel>, #tpu.dimension_semantics<arbitrary>], iteration_bounds = array<i64: 1, 1, 1>, scalar_prefetch = 0 : i64, scratch_operands = 1 : i64, tpu.core_type = #tpu.core_type<tc>, window_params = [{transform_indices = @transform_0, window_bounds = array<i64: 16, 32>}, {transform_indices = @transform_1, window_bounds = array<i64: 32, 32>}, {transform_indices = @transform_2, window_bounds = array<i64: 1, 32>}, {transform_indices = @transform_3, window_bounds = array<i64: 16, 32>}]} {
    %c0_i32 = arith.constant 0 : i32
    %0 = arith.cmpi eq, %arg2, %c0_i32 : i32
    %1 = arith.extui %0 : i1 to i32
    %c0_i32_0 = arith.constant 0 : i32
    %2 = arith.cmpi ne, %1, %c0_i32_0 : i32
    scf.if %2 {
      %cst_10 = arith.constant 0.000000e+00 : f32
      %12 = vector.broadcast %cst_10 : f32 to vector<16x32xf32>
      %c0_11 = arith.constant 0 : index
      %c0_12 = arith.constant 0 : index
      %13 = vector.load %arg7[%c0_11, %c0_12] : memref<16x32xf32, #tpu.memory_space<vmem>>, vector<16x32xf32>
      tpu.vector_store %arg7[%c0_11, %c0_12], %12 {strides = array<i32>} : memref<16x32xf32, #tpu.memory_space<vmem>>, vector<16x32xf32>,
    } else {
    }
    %c0 = arith.constant 0 : index
    %c0_1 = arith.constant 0 : index
    %3 = vector.load %arg7[%c0, %c0_1] : memref<16x32xf32, #tpu.memory_space<vmem>>, vector<16x32xf32>
    %c0_2 = arith.constant 0 : index
    %c0_3 = arith.constant 0 : index
    %4 = vector.load %arg3[%c0_2, %c0_3] : memref<16x32xbf16, #tpu.memory_space<vmem>>, vector<16x32xbf16>
    %c0_4 = arith.constant 0 : index
    %c0_5 = arith.constant 0 : index
    %5 = vector.load %arg4[%c0_4, %c0_5] : memref<32x32xbf16, #tpu.memory_space<vmem>>, vector<32x32xbf16>
    %cst = arith.constant dense<0.000000e+00> : vector<16x32xf32>
    %6 = tpu.matmul %4, %5, %cst {dimension_numbers = #tpu.dot_dimension_numbers<[1], [0], [0], [1], [0, 0, 1, 1], [], []>} : vector<16x32xbf16>, vector<32x32xbf16>, vector<16x32xf32> -> vector<16x32xf32>
    %7 = arith.addf %3, %6 : vector<16x32xf32>
    %c0_6 = arith.constant 0 : index
    %c0_7 = arith.constant 0 : index
    %8 = vector.load %arg7[%c0_6, %c0_7] : memref<16x32xf32, #tpu.memory_space<vmem>>, vector<16x32xf32>
    tpu.vector_store %arg7[%c0_6, %c0_7], %7 {strides = array<i32>} : memref<16x32xf32, #tpu.memory_space<vmem>>, vector<16x32xf32>,
    %c0_i32_8 = arith.constant 0 : i32
    %9 = arith.cmpi eq, %arg2, %c0_i32_8 : i32
    %10 = arith.extui %9 : i1 to i32
    %c0_i32_9 = arith.constant 0 : i32
    %11 = arith.cmpi ne, %10, %c0_i32_9 : i32
    scf.if %11 {
      %c0_10 = arith.constant 0 : index
      %c0_11 = arith.constant 0 : index
      %12 = vector.load %arg7[%c0_10, %c0_11] : memref<16x32xf32, #tpu.memory_space<vmem>>, vector<16x32xf32>
      %c0_12 = arith.constant 0 : index
      %c0_13 = arith.constant 0 : index
      %13 = vector.load %arg5[%c0_12, %c0_13] : memref<1x32xbf16, #tpu.memory_space<vmem>>, vector<1x32xbf16>
      %14 = arith.extf %13 : vector<1x32xbf16> to vector<1x32xf32>
      %15 = vector.broadcast %14 : vector<1x32xf32> to vector<16x32xf32>
      %16 = arith.addf %12, %15 : vector<16x32xf32>
      %17 = arith.truncf %16 : vector<16x32xf32> to vector<16x32xbf16>
      %c0_14 = arith.constant 0 : index
      %c0_15 = arith.constant 0 : index
      %18 = vector.load %arg6[%c0_14, %c0_15] : memref<16x32xbf16, #tpu.memory_space<vmem>>, vector<16x32xbf16>
      tpu.vector_store %arg6[%c0_14, %c0_15], %17 {strides = array<i32>} : memref<16x32xbf16, #tpu.memory_space<vmem>>, vector<16x32xbf16>,
    } else {
    }
    return
  }
  func.func @transform_0(%arg0: i32, %arg1: i32, %arg2: i32) -> (i32, i32) {
    %c0_i32 = arith.constant 0 : i32
    return %arg0, %arg2 : i32, i32
  }
  func.func @transform_1(%arg0: i32, %arg1: i32, %arg2: i32) -> (i32, i32) {
    %c0_i32 = arith.constant 0 : i32
    return %arg2, %arg1 : i32, i32
  }
  func.func @transform_2(%arg0: i32, %arg1: i32, %arg2: i32) -> (i32, i32) {
    %c0_i32 = arith.constant 0 : i32
    %c0_i32_0 = arith.constant 0 : i32
    return %c0_i32, %arg1 : i32, i32
  }
  func.func @transform_3(%arg0: i32, %arg1: i32, %arg2: i32) -> (i32, i32) {
    %c0_i32 = arith.constant 0 : i32
    return %arg0, %arg1 : i32, i32
  }
}

</mosaic_0001>

<bundles_post_ra>
// kernel: tpu_custom_call.1
= control target key start
LH: loop header
LB: loop body
LE: loop exit
PB: predicated region body
PF: predicated region fallthrough
CT: control target
= control target key end

     0   :  { %8 = vsyncpa [#allocation4], 0  ;;  %s348_s0 = inlined_call_operand.hbm [shape: bf16[16,32], index: 0, kind: input, shape index: {}]   ;;  %s349_s1 = inlined_call_operand.hbm [shape: bf16[32,32], index: 1, kind: input, shape index: {}]   ;;  %s350_s2 = inlined_call_operand.vmem [shape: bf16[1,32], index: 2, kind: input, shape index: {}]   ;;  %s351_s3 = inlined_call_operand.hbm [shape: bf16[16,32], index: 3, kind: output, shape index: {}]  }
   0x1   :  { %9 = vsyncpa [#allocation7], 0 }
   0x2   :  { %10 = vsyncpa [#allocation5], 0  ;;  %s268_s12 = smov [#allocation3]   ;;  %s196_s16 = scalar_lea.hbm %s348_s0, 128 }
   0x3   :  { %s16_s13 = sshll.u32 %s268_s12, 4  ;;  %p197_p0 = scmp.ne.s32.totalorder %s348_s0, %s196_s16  ;;  %s17_s13 = int_to_ptr.vmem [resolvable:$true] %s16_s13 }
   0x4   :  { %p200_p1 = scmp.lt.u32.totalorder %s196_s16, %s348_s0 }
   0x6   :  { %p202_p2 = pnand %p200_p1, %p197_p0 }
   0x8   :  { %205 = shalt.err (!%p202_p2)
}
   0x9   :  { %s206_s21 = scalar_lea.vmem %s17_s13, 128  ;;  %p211_p4 = scmp.lt.s32.totalorder %s17_s13, %s17_s13 }
   0xa   :  { %p207_p3 = scmp.ne.s32.totalorder %s17_s13, %s206_s21  ;;  %p212_p5 = scmp.lt.s32.totalorder %s206_s21, %s206_s21 }
   0xc   :  { %p213_p6 = por %p212_p5, %p211_p4 }
   0xe   :  { %p214_p7 = pnand %p213_p6, %p207_p3 }
  0x10   :  { %217 = shalt.err (!%p214_p7)
}
  0x11   :  { %s269_s22 = smov 64   ;;  %s270_s23 = smov 4  }
  0x12   :  { %22 = dma.hbm_to_vmem [thread:$0]  %s348_s0, 128, %s17_s13, [#allocation4], %s269_s22, %s269_s22, %s270_s23  }
  0x13   :  { %s271_s26 = smov [#allocation6]   ;;  %s218_s30 = scalar_lea.hbm %s349_s1, 256 }
  0x14   :  { %s28_s27 = sshll.u32 %s271_s26, 4  ;;  %p219_p8 = scmp.ne.s32.totalorder %s349_s1, %s218_s30  ;;  %s29_s27 = int_to_ptr.vmem [resolvable:$true] %s28_s27 }
  0x15   :  { %p222_p9 = scmp.lt.u32.totalorder %s218_s30, %s349_s1 }
  0x17   :  { %p224_p10 = pnand %p222_p9, %p219_p8 }
  0x19   :  { %227 = shalt.err (!%p224_p10)
}
  0x1a   :  { %s228_s8 = scalar_lea.vmem %s29_s27, 256  ;;  %p233_p12 = scmp.lt.s32.totalorder %s29_s27, %s29_s27 }
  0x1b   :  { %p229_p11 = scmp.ne.s32.totalorder %s29_s27, %s228_s8  ;;  %p234_p13 = scmp.lt.s32.totalorder %s228_s8, %s228_s8 }
  0x1d   :  { %p235_p0 = por %p234_p13, %p233_p12 }
  0x1f   :  { %p236_p1 = pnand %p235_p0, %p229_p11 }
  0x21   :  { %239 = shalt.err (!%p236_p1)
}
  0x22   :  { %34 = dma.hbm_to_vmem [thread:$0]  %s349_s1, 256, %s29_s27, [#allocation7], %s269_s22, %s269_s22, %s270_s23  }
  0x23   :  { %262 = dma.done.wait [#allocation4], 128  }
  0x24   :  { %263 = vsyncadd [#allocation4], 4294967168 }
  0x25   :  { %264 = dma.done.wait [#allocation7], 256  }
  0x26   :  { %265 = vsyncadd [#allocation7], 4294967040  ;;  %vm48_vm0 = vcmask 261120   ;;  %v272_v0 = vmov 0.0   ;;  %vm273_vm1 = vmmov 0   ;;  %v193_v1 = vld [vmem:[#allocation6] sm:$0xff]   ;;  %v132_v4 = vlaneseq }
  0x27   :  { %178 = vmatprep.subr.bf16.mxu0 %v272_v0  ;;  %182 = vmatprep.mubr.msk.bf16.mxu0 %vm273_vm1, %v272_v0  ;;  %49 = vst.msk [vmem:[#allocation2] sm:$0xff] %vm48_vm0, %v272_v0  ;;  %50 = vst.msk [vmem:[#allocation2 + $0x8] sm:$0xff] %vm48_vm0, %v272_v0  ;;  %v194_v2 = vld [vmem:[#allocation6 + $0x8] sm:$0xff]   ;;  %v195_v3 = vld [vmem:[#allocation3] sm:$0xff]   ;;  %vm146_vm2 = vcmask 257024   ;;  %s274_s11 = smov [#allocation8]  }
  0x28   :  { %179 = vmatpush3.bf16.msra.mxu0 %v193_v1  ;;  %v133_v6 = vshrl.u32 %v132_v4, 7  ;;  %v130_v9 = vld [vmem:[%s350_s2] sm:$0x1]  ;;  %s154_s12 = sshll.u32 %s274_s11, 4  ;;  %s155_s12 = int_to_ptr.vmem [resolvable:$true] %s154_s12 }
  0x29   :  { %180 = vmatprep.subr.bf16.mxu0 %v272_v0  ;;  %v131_v15 = vunpack.c.l.bf16 %v130_v9  ;;  %s240_s2 = scalar_lea.vmem %s155_s12, 128  ;;  %p245_p3 = scmp.lt.s32.totalorder %s155_s12, %s155_s12 }
  0x2a   :  { %v134_v16 = vsub.s32 0, %v133_v6  ;;  %p241_p2 = scmp.ne.s32.totalorder %s155_s12, %s240_s2  ;;  %p246_p4 = scmp.lt.s32.totalorder %s240_s2, %s240_s2 }
  0x2c   :  { %181 = vmatpush3.bf16.msra.mxu0 %v194_v2  ;;  %v135_v17 = vrot.slane %v131_v15, %v134_v16  ;;  %p247_p5 = por %p246_p4, %p245_p3 }
  0x2e   :  { %v51_v5 = vld [vmem:[#allocation2] sm:$0xff]  ;;  %v52_v8 = vld [vmem:[#allocation2 + $0x8] sm:$0xff]  ;;  %p248_p6 = pnand %p247_p5, %p241_p2 }
  0x2f   :  { %183 = vmatmul.mubr.msk.bf16.vlgmr.msra.gmra.mrb[0].mxu0 %vm48_vm0, %v195_v3 }
 0x102   :  { %v114_v7 = vpop.f32.mrb[0].mxu0 }
 0x103   :  { %v121_v10 = vadd.f32 %v114_v7, %v51_v5  ;;  %v184_v11 = vpop.f32.mrb[1].mxu0 }
 0x104   :  { %v117_v12 = vpop.f32.mrb[2].mxu0 }
 0x105   :  { %123 = vst.msk [vmem:[#allocation2] sm:$0xff] %vm48_vm0, %v121_v10  ;;  %v122_v13 = vadd.f32 %v117_v12, %v52_v8  ;;  %v185_v14 = vpop.f32.mrb[3].mxu0 }
 0x107   :  { %124 = vst.msk [vmem:[#allocation2 + $0x8] sm:$0xff] %vm48_vm0, %v122_v13 }
 0x10c   :  { %v128_v18 = vld [vmem:[#allocation2] sm:$0xff] }
 0x10d   :  { %v136_v19 = vadd.f32 %v135_v17, %v128_v18 }
 0x10e   :  { %v129_v20 = vld [vmem:[#allocation2 + $0x8] sm:$0xff] }
 0x10f   :  { %v137_v21 = vadd.f32 %v135_v17, %v129_v20  ;;  %v173_v22 = vpack.c.bf16 %v136_v19, %v136_v19 }
 0x111   :  { %v174_v23 = vpack.c.bf16 %v137_v21, %v137_v21  ;;  %147 = vst.msk [vmem:[#allocation8] sm:$0xf] %vm146_vm2, %v173_v22 }
 0x113   :  { %148 = vst.msk [vmem:[#allocation8 + $0x4] sm:$0xf] %vm146_vm2, %v174_v23 }
 0x114   :  { %251 = shalt.err (!%p248_p6)
}
 0x115   :  { %s252_s15 = scalar_lea.hbm %s351_s3, 128 }
 0x116   :  { %p253_p7 = scmp.ne.s32.totalorder %s351_s3, %s252_s15  ;;  %p256_p8 = scmp.lt.u32.totalorder %s252_s15, %s351_s3 }
 0x118   :  { %p258_p9 = pnand %p256_p8, %p253_p7 }
 0x11a   :  { %261 = shalt.err (!%p258_p9)
}
 0x11b   :  { %160 = dma.vmem_to_hbm [thread:$0]  %s155_s12, 128, %s351_s3, [#allocation5], %s269_s22, %s269_s22, %s270_s23  }
 0x11c   :  { %266 = dma.done.wait [#allocation5], 128  }
 0x11d   :  { %267 = vsyncadd [#allocation5], 4294967168 }
 0x11e   :  { %164 = vsyncpa [#allocation4], 1 }
 0x11f   :  { %165 = vsyncpa [#allocation7], 1 }
 0x120   :  { %166 = vsyncpa [#allocation5], 1 }

</bundles_post_ra>
